<compile_context>
chip_gen: v7x
topology: tpu7x:2x2x1
jax: 0.10.0
libtpu: 0.0.40
codegen_flags: <defaults>
</compile_context>

<pallas_src>
import functools

import jax
import jax.numpy as jnp
from jax.experimental import pallas as pl
from jax.experimental.pallas import tpu as pltpu

LANE = 128
_RESIDENT_XW_BYTES = 8 * 1024 * 1024   # keep XW fully VMEM-resident below this


def _round_up(x, m):
    return ((x + m - 1) // m) * m


def _pick_tile(n):
    """Square S-tile edge (multiple of 128). 512 by default (HBM-bound kernel
    -> biggest tile), capped for tiny graphs, and reduced so the parallel row
    axis has >= 2 blocks whenever the graph allows (v7x megacore sharding)."""
    tile = min(512, _round_up(n, LANE))
    while (tile > LANE
           and _round_up(n, tile) // tile < 2
           and _round_up(n, LANE) >= 2 * LANE):
        tile //= 2
    return tile


# ----------------------------------------------------------------------------
# Feature transform: XW = dinv * (X @ W), lane-dense bf16 output.
# ----------------------------------------------------------------------------
def _xw_kernel(x_ref, w_ref, dinv_ref, o_ref):
    xw = jnp.dot(x_ref[...], w_ref[...], preferred_element_type=jnp.float32)
    o_ref[...] = (xw * dinv_ref[...]).astype(o_ref.dtype)


def _feature_transform(x_pad, w_pad, dinv_pad, *, tile):
    npad, f_in = x_pad.shape
    f_out = w_pad.shape[1]
    return pl.pallas_call(
        _xw_kernel,
        out_shape=jax.ShapeDtypeStruct((npad, f_out), jnp.bfloat16),
        grid_spec=pltpu.PrefetchScalarGridSpec(
            num_scalar_prefetch=0,
            grid=(npad // tile,),
            in_specs=[
                pl.BlockSpec((tile, f_in), lambda i: (i, 0)),    # X row tile
                pl.BlockSpec((f_in, f_out), lambda i: (0, 0)),   # W (resident)
                pl.BlockSpec((tile, 1), lambda i: (i, 0)),       # dinv row slab
            ],
            out_specs=pl.BlockSpec((tile, f_out), lambda i: (i, 0)),
        ),
        compiler_params=pltpu.CompilerParams(
            dimension_semantics=("parallel",),
            vmem_limit_bytes=32 * 1024 * 1024,
        ),
    )(x_pad, w_pad, dinv_pad)


# ----------------------------------------------------------------------------
# Aggregation: out = [relu](dinv * (S @ XW) + b), S streamed as int8 tiles.
# ----------------------------------------------------------------------------
def _aggregate_kernel(s_ref, xw_ref, dinv_ref, b_ref, out_ref, *scratch,
                      relu, xw_resident, tile):
    # f32 accumulator: dedicated scratch for bf16 outputs, the (VMEM-resident)
    # output block itself for f32 outputs.
    acc = scratch[0] if scratch else out_ref
    k = pl.program_id(1)

    @pl.when(k == 0)
    def _():
        acc[...] = jnp.zeros_like(acc)

    if xw_resident:
        start = pl.multiple_of(k * tile, tile)
        xw = xw_ref[pl.ds(start, tile), :]
    else:
        xw = xw_ref[...]

    # int8 0/1 adjacency tile -> bf16 on the VPU, then MXU with f32 accumulate.
    s_tile = s_ref[...].astype(jnp.bfloat16)
    acc[...] += jnp.dot(s_tile, xw, preferred_element_type=jnp.float32)

    @pl.when(k == pl.num_programs(1) - 1)
    def _():
        y = acc[...] * dinv_ref[...] + b_ref[...]     # fold left dinv + bias (f32, VPU)
        if relu:
            y = jnp.maximum(y, 0.0)
        out_ref[...] = y.astype(out_ref.dtype)


def _gcn_aggregate(s_pad, xw, dinv_pad, b, *, out_dtype, relu, tile):
    npad = s_pad.shape[0]
    f_out = xw.shape[1]
    grid = (npad // tile, npad // tile)

    xw_resident = xw.size * xw.dtype.itemsize <= _RESIDENT_XW_BYTES
    if xw_resident:
        xw_spec = pl.BlockSpec((npad, f_out), lambda i, k: (0, 0))   # fetched once
    else:
        xw_spec = pl.BlockSpec((tile, f_out), lambda i, k: (k, 0))   # K-slab stream

    scratch_shapes = []
    if out_dtype != jnp.float32:
        scratch_shapes.append(pltpu.VMEM((tile, f_out), jnp.float32))

    kernel = functools.partial(_aggregate_kernel, relu=relu,
                               xw_resident=xw_resident, tile=tile)
    return pl.pallas_call(
        kernel,
        out_shape=jax.ShapeDtypeStruct((npad, f_out), out_dtype),
        grid_spec=pltpu.PrefetchScalarGridSpec(
            num_scalar_prefetch=0,
            grid=grid,
            in_specs=[
                pl.BlockSpec((tile, tile), lambda i, k: (i, k)),   # S tile (int8)
                xw_spec,                                           # pre-scaled XW
                pl.BlockSpec((tile, 1), lambda i, k: (i, 0)),      # dinv row slab
                pl.BlockSpec((1, f_out), lambda i, k: (0, 0)),     # bias (resident)
            ],
            out_specs=pl.BlockSpec((tile, f_out), lambda i, k: (i, 0)),
            scratch_shapes=scratch_shapes,
        ),
        compiler_params=pltpu.CompilerParams(
            dimension_semantics=("parallel", "arbitrary"),
            vmem_limit_bytes=32 * 1024 * 1024,
        ),
    )(s_pad, xw, dinv_pad, b)


# ----------------------------------------------------------------------------
# Graph prep + full forward.
# ----------------------------------------------------------------------------
def gcn_graph(edge_index, num_nodes):
    """Dense S = A + I (small-integer entries, stored int8) and dinv = deg^{-1/2},
    matching PyG gcn_norm:  A_hat = dinv[:, None] * S * dinv[None, :]."""
    # TODO(synk): for large graphs replace this dense N x N build (and the dense
    # S @ XW aggregation) with a CSR SpMM using scalar-prefetched row pointers.
    src, dst = edge_index[0], edge_index[1]
    s = jnp.zeros((num_nodes, num_nodes), jnp.float32)
    s = s.at[dst, src].add(1.0)                       # message flows src -> dst
    s = s + jnp.eye(num_nodes, dtype=jnp.float32)     # self loops
    deg = s.sum(axis=1)
    dinv = jnp.where(deg > 0.0, 1.0 / jnp.sqrt(deg), 0.0)
    return s.astype(jnp.int8), dinv.astype(jnp.float32)


def vgae_conv_forward(edge_index, x, w1, b1, w2, b2, w3, b3, *, tile=None):
    """mu, sigma of the VGAE encoder (2-layer GCN, fused mean/var branch)."""
    n, _ = x.shape
    h_dim = w1.shape[1]
    d = w2.shape[1]
    if tile is None:
        tile = _pick_tile(n)

    s, dinv = gcn_graph(edge_index, n)

    npad = _round_up(n, tile)
    s_pad = jnp.pad(s, ((0, npad - n), (0, npad - n)))          # zero pad: no leak
    dinv_pad = jnp.pad(dinv, (0, npad - n)).reshape(npad, 1)
    x_pad = jnp.pad(x, ((0, npad - n), (0, 0))).astype(jnp.bfloat16)

    # Lane-dense layer 1: pad W1/b1 to 128 output columns (zeros).
    hpad = _round_up(h_dim, LANE)
    w1p = jnp.pad(w1.astype(jnp.bfloat16), ((0, 0), (0, hpad - h_dim)))
    b1p = jnp.pad(b1.astype(jnp.float32).reshape(1, -1),
                  ((0, 0), (0, hpad - h_dim)))

    # Fused + lane-dense layer 2: W23 = [W2 | W3]; padded rows (h padding) and
    # padded columns (lane padding) are zero.
    two_d = 2 * d
    dpad = _round_up(two_d, LANE)
    w23 = jnp.concatenate([w2, w3], axis=1).astype(jnp.bfloat16)
    w23 = jnp.pad(w23, ((0, hpad - h_dim), (0, dpad - two_d)))
    b23 = jnp.concatenate([b2.reshape(1, -1), b3.reshape(1, -1)],
                          axis=1).astype(jnp.float32)
    b23 = jnp.pad(b23, ((0, 0), (0, dpad - two_d)))

    # Layer 1: h = relu(dinv * (S @ (dinv * (X @ W1))) + b1), bf16, 128-wide.
    # (Padded rows of h equal relu(b1); they never leak -- S columns for padded
    #  nodes are zero and dinv is zero there -- and are sliced off at the end.)
    xw1 = _feature_transform(x_pad, w1p, dinv_pad, tile=tile)
    h = _gcn_aggregate(s_pad, xw1, dinv_pad, b1p,
                       out_dtype=jnp.bfloat16, relu=True, tile=tile)

    # Layer 2 (fused mean/var): dinv * (S @ (dinv * (h @ [W2|W3]))) + [b2|b3].
    xw2 = _feature_transform(h, w23, dinv_pad, tile=tile)
    out = _gcn_aggregate(s_pad, xw2, dinv_pad, b23,
                         out_dtype=jnp.float32, relu=False, tile=tile)

    mu = out[:n, :d]
    sigma = out[:n, d:two_d]
    return mu, sigma


def glorot(key, fan_in, fan_out):
    limit = jnp.sqrt(6.0 / (fan_in + fan_out))
    return jax.random.uniform(key, (fan_in, fan_out), jnp.float32,
                              minval=-limit, maxval=limit)


if __name__ == "__main__":
    # Small shapes implied by the module: N nodes, num_node_features=8,
    # hidden_dim=32, dim=4.
    N, F, H, D = 16, 8, 32, 4

    key = jax.random.PRNGKey(0)
    kx, k1, k2, k3, kb1, kb2, kb3 = jax.random.split(key, 7)

    # Deterministic graph: undirected ring (both directions).
    idx = jnp.arange(N)
    src = jnp.concatenate([idx, (idx + 1) % N])
    dst = jnp.concatenate([(idx + 1) % N, idx])
    edge_index = jnp.stack([src, dst], axis=0)          # (2, 2N)

    x = jax.random.normal(kx, (N, F), jnp.float32)      # node features

    w1 = glorot(k1, F, H)
    b1 = 0.1 * jax.random.normal(kb1, (1, H), jnp.float32)
    w2 = glorot(k2, H, D)
    b2 = 0.1 * jax.random.normal(kb2, (1, D), jnp.float32)
    w3 = glorot(k3, H, D)
    b3 = 0.1 * jax.random.normal(kb3, (1, D), jnp.float32)

    mu, sigma = vgae_conv_forward(edge_index, x, w1, b1, w2, b2, w3, b3)
    mu = jax.block_until_ready(mu)
    sigma = jax.block_until_ready(sigma)

    # Pure-JAX f32 reference.
    s_ref, dinv_ref = gcn_graph(edge_index, N)
    a_hat = dinv_ref[:, None] * s_ref.astype(jnp.float32) * dinv_ref[None, :]
    h_ref = jnp.maximum(a_hat @ (x @ w1) + b1, 0.0)
    mu_ref = a_hat @ (h_ref @ w2) + b2
    sigma_ref = a_hat @ (h_ref @ w3) + b3

    assert mu.shape == (N, D) and sigma.shape == (N, D)
    # bf16 MXU operands (XW, h) with f32 accumulation -> slightly loose tol;
    # the int8 adjacency itself is exact.
    assert jnp.allclose(mu, mu_ref, atol=3e-2, rtol=3e-2)
    assert jnp.allclose(sigma, sigma_ref, atol=3e-2, rtol=3e-2)

    print("KERNEL_OK")
</pallas_src>

<mosaic_0001>
module attributes {stable_mosaic.version = 11 : i64} {
  func.func @_xw_kernel(%arg0: i32, %arg1: memref<128x8xbf16, #tpu.memory_space<vmem>>, %arg2: memref<8x128xbf16, #tpu.memory_space<vmem>>, %arg3: memref<128x1xf32, #tpu.memory_space<vmem>>, %arg4: memref<128x128xbf16, #tpu.memory_space<vmem>>) attributes {dimension_semantics = [#tpu.dimension_semantics<parallel>], iteration_bounds = array<i64: 1>, scalar_prefetch = 0 : i64, scratch_operands = 0 : i64, tpu.core_type = #tpu.core_type<tc>, window_params = [{transform_indices = @transform_0, window_bounds = array<i64: 128, 8>}, {pipeline_mode = #tpu.pipeline_mode<synchronous>, transform_indices = @transform_1, window_bounds = array<i64: 8, 128>}, {transform_indices = @transform_2, window_bounds = array<i64: 128, 1>}, {transform_indices = @transform_3, window_bounds = array<i64: 128, 128>}]} {
    %c0 = arith.constant 0 : index
    %c0_0 = arith.constant 0 : index
    %0 = vector.load %arg1[%c0, %c0_0] : memref<128x8xbf16, #tpu.memory_space<vmem>>, vector<128x8xbf16>
    %c0_1 = arith.constant 0 : index
    %c0_2 = arith.constant 0 : index
    %1 = vector.load %arg2[%c0_1, %c0_2] : memref<8x128xbf16, #tpu.memory_space<vmem>>, vector<8x128xbf16>
    %cst = arith.constant dense<0.000000e+00> : vector<128x128xf32>
    %2 = tpu.matmul %0, %1, %cst {dimension_numbers = #tpu.dot_dimension_numbers<[1], [0], [0], [1], [0, 0, 1, 1], [], []>} : vector<128x8xbf16>, vector<8x128xbf16>, vector<128x128xf32> -> vector<128x128xf32>
    %c0_3 = arith.constant 0 : index
    %c0_4 = arith.constant 0 : index
    %3 = vector.load %arg3[%c0_3, %c0_4] : memref<128x1xf32, #tpu.memory_space<vmem>>, vector<128x1xf32>
    %4 = vector.broadcast %3 : vector<128x1xf32> to vector<128x128xf32>
    %5 = arith.mulf %2, %4 : vector<128x128xf32>
    %6 = arith.truncf %5 : vector<128x128xf32> to vector<128x128xbf16>
    %c0_5 = arith.constant 0 : index
    %c0_6 = arith.constant 0 : index
    %7 = vector.load %arg4[%c0_5, %c0_6] : memref<128x128xbf16, #tpu.memory_space<vmem>>, vector<128x128xbf16>
    tpu.vector_store %arg4[%c0_5, %c0_6], %6 {strides = array<i32>} : memref<128x128xbf16, #tpu.memory_space<vmem>>, vector<128x128xbf16>,
    return
  }
  func.func @transform_0(%arg0: i32) -> (i32, i32) {
    %c0_i32 = arith.constant 0 : i32
    %c0_i32_0 = arith.constant 0 : i32
    return %arg0, %c0_i32 : i32, i32
  }
  func.func @transform_1(%arg0: i32) -> (i32, i32) {
    %c0_i32 = arith.constant 0 : i32
    %c0_i32_0 = arith.constant 0 : i32
    %c0_i32_1 = arith.constant 0 : i32
    return %c0_i32, %c0_i32_0 : i32, i32
  }
  func.func @transform_2(%arg0: i32) -> (i32, i32) {
    %c0_i32 = arith.constant 0 : i32
    %c0_i32_0 = arith.constant 0 : i32
    return %arg0, %c0_i32 : i32, i32
  }
  func.func @transform_3(%arg0: i32) -> (i32, i32) {
    %c0_i32 = arith.constant 0 : i32
    %c0_i32_0 = arith.constant 0 : i32
    return %arg0, %c0_i32 : i32, i32
  }
}

</mosaic_0001>

<bundles_post_ra>
// kernel: tpu_custom_call.1
= control target key start
LH: loop header
LB: loop body
LE: loop exit
PB: predicated region body
PF: predicated region fallthrough
CT: control target
= control target key end

     0   :  { %vm98_vm0 = vcmask 1043456   ;;  %vm73_vm1 = vcmask 64512   ;;  %v571_v5 = vmov 0   ;;  %s690_s0 = inlined_call_operand.vmem [shape: bf16[128,8], index: 0, kind: input, shape index: {}]   ;;  %s691_s1 = inlined_call_operand.vmem [shape: bf16[8,128], index: 1, kind: input, shape index: {}]   ;;  %s692_s2 = inlined_call_operand.vmem [shape: f32[128,1], index: 2, kind: input, shape index: {}]   ;;  %s693_s3 = inlined_call_operand.hbm [shape: bf16[128,128], index: 3, kind: output, shape index: {}]  }
   0x1   :  { %v32_v0 = vld [vmem:[%s691_s1] sm:$0xf]  ;;  %v541_v4 = vld [vmem:[%s690_s0 + $0x8] sm:$0xff]   ;;  %538 = vset.pattern.permute.xlu1 %v571_v5  ;;  %537 = vset.pattern.permute.xlu0 %v571_v5  ;;  %v543_v7 = vld [vmem:[%s690_s0 + $0x10] sm:$0xff]  }
   0x2   :  { %v539_v1 = vld [vmem:[%s690_s0] sm:$0xff]   ;;  %531 = vmatprep.subr.msk.bf16.mxu0 %vm98_vm0, %v32_v0  ;;  %532 = vmatprep.subr.msk.bf16.mxu1 %vm98_vm0, %v32_v0  ;;  %v100_v2 = vsel %vm98_vm0, %v32_v0, 0  ;;  %v542_v6 = vld [vmem:[%s690_s0 + $0x28] sm:$0xff]   ;;  %v544_v8 = vld [vmem:[%s690_s0 + $0x30] sm:$0xff]  }
   0x3   :  { %512 = vmatpush3.bf16.msra.mxu0 %v100_v2  ;;  %530 = vmatpush3.bf16.msra.mxu1 %v100_v2  ;;  %v540_v3 = vld [vmem:[%s690_s0 + $0x20] sm:$0xff]   ;;  %v201_v9 = vld [vmem:[%s692_s2 + $0x10] sm:$0xff]  ;;  %v545_v10 = vld [vmem:[%s690_s0 + $0x18] sm:$0xff]  }
   0x4   :  { %513 = vmatprep.mubr.msk.bf16.mxu0 %vm73_vm1, %v539_v1  ;;  %521 = vmatprep.mubr.msk.bf16.mxu1 %vm73_vm1, %v540_v3  ;;  %v199_v11 = vld [vmem:[%s692_s2] sm:$0xff]  ;;  %v546_v12 = vld [vmem:[%s690_s0 + $0x38] sm:$0xff]   ;;  %v200_v14 = vld [vmem:[%s692_s2 + $0x8] sm:$0xff] }
   0x5   :  { %227 = vperm.xlu1 %538, %v201_v9   ;;  %217 = vperm.xlu0 %537, %v199_v11   ;;  %v202_v13 = vld [vmem:[%s692_s2 + $0x18] sm:$0xff]  ;;  %v204_v15 = vld [vmem:[%s692_s2 + $0x28] sm:$0xff] }
   0x6   :  { %514 = vmatmul.mubr.msk.bf16.vlgmr.msra.gmra.mrb[0].mxu0 %vm73_vm1, %v541_v4  ;;  %522 = vmatmul.mubr.msk.bf16.vlgmr.msra.gmra.mrb[0].mxu1 %vm73_vm1, %v542_v6 }
   0x7   :  { %517 = vmatprep.mubr.msk.bf16.mxu0 %vm73_vm1, %v543_v7  ;;  %525 = vmatprep.mubr.msk.bf16.mxu1 %vm73_vm1, %v544_v8 }
   0x9   :  { %232 = vperm.xlu1 %538, %v202_v13   ;;  %222 = vperm.xlu0 %537, %v200_v14  }
   0xe   :  { %518 = vmatmul.mubr.msk.bf16.gmra.mrb[4].mxu0 %vm73_vm1, %v545_v10  ;;  %526 = vmatmul.mubr.msk.bf16.gmra.mrb[4].mxu1 %vm73_vm1, %v546_v12 }
   0xf   :  { %8 = vsyncpa [#allocation3], 0  ;;  %v203_v16 = vld [vmem:[%s692_s2 + $0x20] sm:$0xff]  ;;  %242 = vperm.xlu1 %538, %v204_v15   ;;  %v206_v17 = vld [vmem:[%s692_s2 + $0x38] sm:$0xff] }
  0x10   :  { %237 = vperm.xlu0 %537, %v203_v16   ;;  %v205_v18 = vld [vmem:[%s692_s2 + $0x30] sm:$0xff]  ;;  %v208_v19 = vld [vmem:[%s692_s2 + $0x48] sm:$0xff]  ;;  %v207_v20 = vld [vmem:[%s692_s2 + $0x40] sm:$0xff] }
  0x11   :  { %v210_v21 = vld [vmem:[%s692_s2 + $0x58] sm:$0xff]  ;;  %v209_v22 = vld [vmem:[%s692_s2 + $0x50] sm:$0xff]  ;;  %v212_v23 = vld [vmem:[%s692_s2 + $0x68] sm:$0xff] }
  0x12   :  { %v211_v24 = vld [vmem:[%s692_s2 + $0x60] sm:$0xff]  ;;  %v214_v25 = vld [vmem:[%s692_s2 + $0x78] sm:$0xff]  ;;  %v213_v26 = vld [vmem:[%s692_s2 + $0x70] sm:$0xff]  ;;  %s572_s2 = smov [#allocation2]  }
  0x13   :  { %252 = vperm.xlu1 %538, %v206_v17   ;;  %s396_s5 = sshll.u32 %s572_s2, 4  ;;  %s397_s5 = int_to_ptr.vmem [resolvable:$true] %s396_s5 }
  0x14   :  { %247 = vperm.xlu0 %537, %v205_v18   ;;  %s547_s6 = scalar_lea.vmem %s397_s5, 1024  ;;  %p552_p1 = scmp.lt.s32.totalorder %s397_s5, %s397_s5 }
  0x15   :  { %p548_p0 = scmp.ne.s32.totalorder %s397_s5, %s547_s6  ;;  %p553_p2 = scmp.lt.s32.totalorder %s547_s6, %s547_s6 }
  0x17   :  { %262 = vperm.xlu1 %538, %v208_v19   ;;  %p554_p3 = por %p553_p2, %p552_p1 }
  0x18   :  { %257 = vperm.xlu0 %537, %v207_v20  }
  0x19   :  { %p555_p4 = pnand %p554_p3, %p548_p0 }
  0x1b   :  { %272 = vperm.xlu1 %538, %v210_v21  }
  0x1c   :  { %267 = vperm.xlu0 %537, %v209_v22  }
  0x1f   :  { %282 = vperm.xlu1 %538, %v212_v23  }
  0x20   :  { %277 = vperm.xlu0 %537, %v211_v24  }
  0x23   :  { %292 = vperm.xlu1 %538, %v214_v25  }
  0x24   :  { %287 = vperm.xlu0 %537, %v213_v26  }
  0x84   :  { %v228_v27 = vpop.permute.xlu1 %227  ;;  %v218_v28 = vpop.permute.xlu0 %217 }
  0x88   :  { %v233_v29 = vpop.permute.xlu1 %232  ;;  %v223_v30 = vpop.permute.xlu0 %222 }
  0x8e   :  { %v243_v31 = vpop.permute.xlu1 %242 }
  0x8f   :  { %v238_v32 = vpop.permute.xlu0 %237 }
  0x92   :  { %v253_v33 = vpop.permute.xlu1 %252 }
  0x93   :  { %v248_v34 = vpop.permute.xlu0 %247 }
  0x96   :  { %v263_v35 = vpop.permute.xlu1 %262 }
  0x97   :  { %v258_v36 = vpop.permute.xlu0 %257 }
  0x9a   :  { %v273_v37 = vpop.permute.xlu1 %272 }
  0x9b   :  { %v268_v38 = vpop.permute.xlu0 %267 }
  0x9e   :  { %v283_v39 = vpop.permute.xlu1 %282 }
  0x9f   :  { %v278_v40 = vpop.permute.xlu0 %277 }
  0xa2   :  { %v293_v60 = vpop.permute.xlu1 %292 }
  0xa3   :  { %v288_v62 = vpop.permute.xlu0 %287 }
  0xd9   :  { %v515_v41 = vpop.f32.mrb[0].mxu0  ;;  %v523_v42 = vpop.f32.mrb[0].mxu1 }
  0xda   :  { %v136_v43 = vpop.f32.mrb[1].mxu0  ;;  %v168_v44 = vpop.f32.mrb[1].mxu1  ;;  %v297_v46 = vmul.f32 %v515_v41, %v228_v27  ;;  %v305_v50 = vmul.f32 %v523_v42, %v268_v38 }
  0xdb   :  { %v516_v45 = vpop.f32.mrb[2].mxu0  ;;  %v524_v48 = vpop.f32.mrb[2].mxu1  ;;  %v295_v51 = vmul.f32 %v218_v28, %v136_v43  ;;  %v303_v55 = vmul.f32 %v258_v36, %v168_v44 }
  0xdc   :  { %v298_v47 = vmul.f32 %v516_v45, %v233_v29  ;;  %v139_v49 = vpop.f32.mrb[3].mxu0  ;;  %v306_v52 = vmul.f32 %v524_v48, %v273_v37  ;;  %v171_v54 = vpop.f32.mrb[3].mxu1 }
  0xdd   :  { %v296_v53 = vmul.f32 %v223_v30, %v139_v49  ;;  %v304_v57 = vmul.f32 %v263_v35, %v171_v54 }
  0xde   :  { %v463_v56 = vpack.c.bf16 %v298_v47, %v297_v46  ;;  %v483_v58 = vpack.c.bf16 %v306_v52, %v305_v50 }
  0xdf   :  { %v458_v59 = vpack.c.bf16 %v296_v53, %v295_v51  ;;  %v478_v61 = vpack.c.bf16 %v304_v57, %v303_v55 }
  0xe0   :  { %495 = vst [vmem:[#allocation2 + $0x8] sm:$0xff] %v463_v56   ;;  %499 = vst [vmem:[#allocation2 + $0x28] sm:$0xff] %v483_v58  }
  0xe1   :  { %459 = vst [vmem:[#allocation2] sm:$0xff] %v458_v59   ;;  %v519_v63 = vpop.f32.mrb[4].mxu0  ;;  %498 = vst [vmem:[#allocation2 + $0x20] sm:$0xff] %v478_v61   ;;  %v527_v0 = vpop.f32.mrb[4].mxu1 }
  0xe2   :  { %v152_v1 = vpop.f32.mrb[5].mxu0  ;;  %v184_v2 = vpop.f32.mrb[5].mxu1  ;;  %v301_v4 = vmul.f32 %v519_v63, %v248_v34  ;;  %v309_v8 = vmul.f32 %v527_v0, %v288_v62 }
  0xe3   :  { %v520_v3 = vpop.f32.mrb[6].mxu0  ;;  %v528_v6 = vpop.f32.mrb[6].mxu1  ;;  %v299_v9 = vmul.f32 %v238_v32, %v152_v1  ;;  %v307_v13 = vmul.f32 %v278_v40, %v184_v2 }
  0xe4   :  { %v302_v5 = vmul.f32 %v520_v3, %v253_v33  ;;  %v155_v7 = vpop.f32.mrb[7].mxu0  ;;  %v310_v10 = vmul.f32 %v528_v6, %v293_v60  ;;  %v187_v12 = vpop.f32.mrb[7].mxu1 }
  0xe5   :  { %v300_v11 = vmul.f32 %v243_v31, %v155_v7  ;;  %v308_v15 = vmul.f32 %v283_v39, %v187_v12 }
  0xe6   :  { %v473_v14 = vpack.c.bf16 %v302_v5, %v301_v4  ;;  %v493_v16 = vpack.c.bf16 %v310_v10, %v309_v8 }
  0xe7   :  { %v468_v17 = vpack.c.bf16 %v300_v11, %v299_v9  ;;  %v488_v18 = vpack.c.bf16 %v308_v15, %v307_v13 }
  0xe8   :  { %497 = vst [vmem:[#allocation2 + $0x18] sm:$0xff] %v473_v14   ;;  %501 = vst [vmem:[#allocation2 + $0x38] sm:$0xff] %v493_v16  }
  0xe9   :  { %496 = vst [vmem:[#allocation2 + $0x10] sm:$0xff] %v468_v17   ;;  %500 = vst [vmem:[#allocation2 + $0x30] sm:$0xff] %v488_v18  }
  0xea   :  { %558 = shalt.err (!%p555_p4)
}
  0xeb   :  { %s559_s9 = scalar_lea.hbm %s693_s3, 1024 }
  0xec   :  { %p560_p5 = scmp.ne.s32.totalorder %s693_s3, %s559_s9  ;;  %p563_p6 = scmp.lt.u32.totalorder %s559_s9, %s693_s3 }
  0xee   :  { %p565_p7 = pnand %p563_p6, %p560_p5 }
  0xf0   :  { %568 = shalt.err (!%p565_p7)
}
  0xf1   :  { %s573_s13 = smov 64   ;;  %s574_s14 = smov 4  }
  0xf2   :  { %402 = dma.vmem_to_hbm [thread:$0]  %s397_s5, 1024, %s693_s3, [#allocation3], %s573_s13, %s573_s13, %s574_s14  }
  0xf3   :  { %569 = dma.done.wait [#allocation3], 1024  }
  0xf4   :  { %570 = vsyncadd [#allocation3], 4294966272 }
  0xf5   :  { %406 = vsyncpa [#allocation3], 1 }

</bundles_post_ra>
